<compile_context>
chip_gen: v6e
topology: v6e:2x2x1
jax: 0.10.0
libtpu: 0.0.40
codegen_flags: <defaults>
</compile_context>

<pallas_src>
import functools

import jax
import jax.numpy as jnp
from jax.experimental import pallas as pl
from jax.experimental.pallas import tpu as pltpu


_MIN_DMA_RUN_BYTES = 2048  # keep each contiguous HBM run along L >= ~2 KiB


# --------------------------------------------------------------------------
# In-kernel helpers
# --------------------------------------------------------------------------
def _tile_stats(x, block_start=None, length=None):
    """Per-tile (max, sum) over the lane (L) axis, in f32.

    When block_start/length are given, lanes past `length` are masked out
    (ragged tail tile).  The validity mask is a single (1, 1, l_blk) lane
    vector broadcast inside the where (no full-tile index tensor).
    """
    xf = x.astype(jnp.float32)
    if block_start is not None:
        offs = block_start + jax.lax.broadcasted_iota(
            jnp.int32, (1, 1, x.shape[-1]), 2)
        valid = offs < length
        tile_max = jnp.max(jnp.where(valid, xf, -jnp.inf), axis=-1)
        tile_sum = jnp.sum(jnp.where(valid, xf, 0.0), axis=-1)
    else:
        tile_max = jnp.max(xf, axis=-1)
        tile_sum = jnp.sum(xf, axis=-1)
    return tile_max, tile_sum  # each (b_blk, C) f32


def _accumulate(l, max_acc, sum_acc, tile_max, tile_sum):
    @pl.when(l == 0)
    def _():
        max_acc[...] = tile_max
        sum_acc[...] = tile_sum

    @pl.when(l > 0)
    def _():
        max_acc[...] = jnp.maximum(max_acc[...], tile_max)
        sum_acc[...] = sum_acc[...] + tile_sum


# --------------------------------------------------------------------------
# Fused kernel: streamed L reduction + in-kernel SE MLP epilogue
# --------------------------------------------------------------------------
def _fused_kernel(x_ref, w1t_ref, w2t_ref, o_ref, max_acc, sum_acc,
                  *, inv_len, length, block_l, ragged):
    # x_ref   : (b_blk, C, l_blk)   streamed input tile
    # w1t_ref : (C, H), w2t_ref : (H, C)  resident weights
    # o_ref   : (b_blk, C, 1)       written once, on the last L step
    # max_acc / sum_acc : (b_blk, C) f32 running accumulators (VMEM scratch)
    l = pl.program_id(1)
    n_l = pl.num_programs(1)
    x = x_ref[...]

    if ragged:
        # Only the tail tile pays the mask cost; all full tiles take the
        # plain single-XLU-reduce path.
        tile_max, tile_sum = jax.lax.cond(
            l == n_l - 1,
            lambda xv: _tile_stats(xv, block_start=l * block_l, length=length),
            lambda xv: _tile_stats(xv),
            x)
    else:
        tile_max, tile_sum = _tile_stats(x)

    _accumulate(l, max_acc, sum_acc, tile_max, tile_sum)

    # Epilogue: SE MLP + sigmoid, only on the final L step.
    @pl.when(l == n_l - 1)
    def _():
        max_p = max_acc[...]                      # (b_blk, C) f32
        avg_p = sum_acc[...] * inv_len            # (b_blk, C) f32
        bb = max_p.shape[0]

        # Batch both pooled vectors into one matmul pair (H = C // reduction
        # is tiny, so the MXU would otherwise be badly underfilled twice).
        p = jnp.concatenate([max_p, avg_p], axis=0)          # (2*bb, C)
        w1t = w1t_ref[...].astype(jnp.float32)                # (C, H)
        w2t = w2t_ref[...].astype(jnp.float32)                # (H, C)

        h = jnp.maximum(jnp.dot(p, w1t, preferred_element_type=jnp.float32), 0.0)
        y = jnp.dot(h, w2t, preferred_element_type=jnp.float32)  # (2*bb, C)

        z = y[:bb] + y[bb:]
        att = 1.0 / (1.0 + jnp.exp(-z))                       # sigmoid, f32
        o_ref[...] = att[:, :, None].astype(o_ref.dtype)


# --------------------------------------------------------------------------
# Pooled-stats kernel (small-batch L-split path): emits per-split max/sum
# --------------------------------------------------------------------------
def _pooled_kernel(x_ref, max_ref, sum_ref, max_acc, sum_acc):
    # x_ref   : (B, C, l_blk)  streamed tile (split s picks disjoint L ranges)
    # max_ref / sum_ref : (1, B, C) f32 outputs, one row per split
    l = pl.program_id(1)
    n_l = pl.num_programs(1)

    tile_max, tile_sum = _tile_stats(x_ref[...])
    _accumulate(l, max_acc, sum_acc, tile_max, tile_sum)

    @pl.when(l == n_l - 1)
    def _():
        max_ref[0] = max_acc[...]
        sum_ref[0] = sum_acc[...]


# --------------------------------------------------------------------------
# Tile sizing (generation-aware)
# --------------------------------------------------------------------------
def _round_up(v, m):
    return ((v + m - 1) // m) * m


def _vmem_capacity_bytes():
    try:
        return int(pltpu.get_tpu_info().vmem_capacity_bytes)
    except Exception:
        return 64 * 1024 * 1024  # conservative (v7x-like) default


def _vmem_budgets(block_bytes=None, vmem_limit_bytes=None):
    """(per-x-block budget, vmem_limit_bytes), sized per TPU generation."""
    if block_bytes is not None:
        limit = vmem_limit_bytes or max(4 * block_bytes, 16 * 1024 * 1024)
        return block_bytes, limit
    cap = _vmem_capacity_bytes()
    if cap >= 100 * 1024 * 1024:
        # v5e / v6e: 128 MiB physical VMEM -> big streamed blocks, fewer steps.
        return 32 * 1024 * 1024, 96 * 1024 * 1024
    # v7x (64 MiB physical) or unknown: stay conservative.
    return 12 * 1024 * 1024, 48 * 1024 * 1024


def _pick_l_block(length, max_block, min_search_block):
    """Full extent if it fits; else prefer a 128-multiple that divides L (no
    ragged tail) as long as it is not much smaller than max_block; otherwise
    take the largest 128-multiple tile and mask the (tail-only) ragged tile."""
    if length <= max_block:
        return length
    top = max(128, (max_block // 128) * 128)
    floor = max(min_search_block, top // 2)
    b = top
    while b >= floor:
        if length % b == 0:
            return b
        b -= 128
    return top


def _choose_tiles(B, C, L, itemsize, per_block_budget):
    b_blk = min(B, 8)
    # Minimum contiguous DMA run along L so the b_blk*C strided runs from the
    # (B, C, L) array don't waste HBM bandwidth on descriptor/stride overhead.
    min_lblk = max(128, _round_up(_MIN_DMA_RUN_BYTES // itemsize, 128))

    def max_lblk_for(bb):
        m = per_block_budget // max(1, bb * C * itemsize)
        return max(128, (m // 128) * 128)

    # If the VMEM budget would squeeze l_blk below the minimum run length
    # (large C), shrink b_blk (down to 1) before shrinking l_blk.
    target = min(min_lblk, _round_up(L, 128))
    while b_blk > 1 and max_lblk_for(b_blk) < target:
        b_blk = max(1, b_blk // 2)

    l_blk = _pick_l_block(L, max_lblk_for(b_blk), min_lblk)
    return b_blk, l_blk


# --------------------------------------------------------------------------
# Wrappers
# --------------------------------------------------------------------------
def _se_jax(p, w1, w2):
    h = jnp.maximum(p @ w1.astype(jnp.float32).T, 0.0)
    return h @ w2.astype(jnp.float32).T


def _channel_attention_fused(x, w1, w2, b_blk, l_blk, grid_b, grid_l,
                             ragged, vmem_limit):
    B, C, L = x.shape
    H = w1.shape[0]
    # Pre-transpose the 1x1-conv weights so the kernel does plain p @ W.
    w1t = jnp.transpose(w1)  # (C, H)
    w2t = jnp.transpose(w2)  # (H, C)

    kernel = functools.partial(
        _fused_kernel,
        inv_len=float(1.0 / L), length=L, block_l=l_blk, ragged=ragged)

    return pl.pallas_call(
        kernel,
        out_shape=jax.ShapeDtypeStruct((B, C, 1), x.dtype),
        grid=(grid_b, grid_l),
        in_specs=[
            # Streamed input tile: new block every (b, l) step.
            pl.BlockSpec((b_blk, C, l_blk), lambda b, l: (b, 0, l)),
            # Weights: constant index_map -> fetched once, resident in VMEM.
            pl.BlockSpec((C, H), lambda b, l: (0, 0)),
            pl.BlockSpec((H, C), lambda b, l: (0, 0)),
        ],
        out_specs=pl.BlockSpec((b_blk, C, 1), lambda b, l: (b, 0, 0)),
        scratch_shapes=[
            pltpu.VMEM((b_blk, C), jnp.float32),  # running max
            pltpu.VMEM((b_blk, C), jnp.float32),  # running sum
        ],
        compiler_params=pltpu.CompilerParams(
            dimension_semantics=("parallel", "arbitrary"),
            vmem_limit_bytes=vmem_limit),
    )(x, w1t, w2t)


def _channel_attention_split(x, w1, w2, l_blk, grid_l, vmem_limit):
    """Small-batch path: split L into 2 independent halves on a parallel grid
    axis (keeps both v7x TensorCores streaming HBM); combine + SE MLP in a
    tiny JAX epilogue."""
    B, C, L = x.shape
    s = 2
    n_l_split = grid_l // s

    max_out, sum_out = pl.pallas_call(
        _pooled_kernel,
        out_shape=(jax.ShapeDtypeStruct((s, B, C), jnp.float32),
                   jax.ShapeDtypeStruct((s, B, C), jnp.float32)),
        grid=(s, n_l_split),
        in_specs=[
            pl.BlockSpec((B, C, l_blk),
                         lambda p, l: (0, 0, p * n_l_split + l)),
        ],
        out_specs=(pl.BlockSpec((1, B, C), lambda p, l: (p, 0, 0)),
                   pl.BlockSpec((1, B, C), lambda p, l: (p, 0, 0))),
        scratch_shapes=[
            pltpu.VMEM((B, C), jnp.float32),
            pltpu.VMEM((B, C), jnp.float32),
        ],
        compiler_params=pltpu.CompilerParams(
            dimension_semantics=("parallel", "arbitrary"),
            vmem_limit_bytes=vmem_limit),
    )(x)

    max_p = jnp.max(max_out, axis=0)                 # (B, C)
    avg_p = jnp.sum(sum_out, axis=0) * (1.0 / L)     # (B, C)
    att = jax.nn.sigmoid(_se_jax(max_p, w1, w2) + _se_jax(avg_p, w1, w2))
    return att[..., None].astype(x.dtype)


def channel_attention(x, w1, w2, *, block_bytes=None, vmem_limit_bytes=None):
    """x: (B, C, L); w1: (H, C) conv1 weight (squeezed); w2: (C, H) conv2 weight.

    Returns sigmoid(se(maxpool(x)) + se(avgpool(x))) with shape (B, C, 1),
    matching the PyTorch module's forward output.  `block_bytes` /
    `vmem_limit_bytes` override the auto (generation-aware) tile budgets.
    """
    B, C, L = x.shape
    H = w1.shape[0]
    assert w1.shape == (H, C) and w2.shape == (C, H)

    itemsize = jnp.dtype(x.dtype).itemsize
    per_block_budget, vmem_limit = _vmem_budgets(block_bytes, vmem_limit_bytes)
    b_blk, l_blk = _choose_tiles(B, C, L, itemsize, per_block_budget)

    grid_b = pl.cdiv(B, b_blk)
    grid_l = pl.cdiv(L, l_blk)
    ragged = (L % l_blk) != 0

    # grid_b == 1 (B <= 8) would leave one v7x TensorCore -- and half the HBM
    # bandwidth -- idle; split L instead when it tiles cleanly into halves.
    use_split = (grid_b == 1 and b_blk == B and not ragged
                 and grid_l >= 2 and grid_l % 2 == 0)

    if use_split:
        return _channel_attention_split(x, w1, w2, l_blk, grid_l, vmem_limit)
    return _channel_attention_fused(x, w1, w2, b_blk, l_blk, grid_b, grid_l,
                                    ragged, vmem_limit)


def channel_attention_ref(x, w1, w2):
    """Pure-JAX reference mirroring the PyTorch forward."""
    max_p = jnp.max(x, axis=-1)    # (B, C)
    avg_p = jnp.mean(x, axis=-1)   # (B, C)

    def se(p):
        h = jnp.maximum(p @ w1.T, 0.0)   # (B, H)
        return h @ w2.T                  # (B, C)

    return jax.nn.sigmoid(se(max_p) + se(avg_p))[..., None]  # (B, C, 1)


if __name__ == "__main__":
    key = jax.random.PRNGKey(0)
    k_x, k_w1, k_w2 = jax.random.split(key, 3)

    B, C, L = 2, 32, 16
    reduction = 16
    H = C // reduction  # 2

    x = jax.random.normal(k_x, (B, C, L), dtype=jnp.float32)
    # Conv1d(channel, channel//reduction, 1, bias=False) -> weight (H, C, 1)
    # Conv1d(channel//reduction, channel, 1, bias=False) -> weight (C, H, 1)
    # Keep the squeezed (out, in) matrices; deterministic synthetic init.
    w1 = jax.random.normal(k_w1, (H, C), dtype=jnp.float32) * 0.1
    w2 = jax.random.normal(k_w2, (C, H), dtype=jnp.float32) * 0.1

    # 1) Primary small-shape check (single tile, fused epilogue).
    out = jax.block_until_ready(channel_attention(x, w1, w2))
    ref = channel_attention_ref(x, w1, w2)
    assert out.shape == (B, C, 1), out.shape
    assert jnp.allclose(out, ref, atol=1e-5, rtol=1e-5), "mismatch (small)"

    # 2) Tiled path: ragged L tail + padded partial last B block (b_blk=8),
    #    forced by a small block budget so it runs at test-sized shapes.
    x2 = jax.random.normal(jax.random.PRNGKey(1), (10, C, 1000), jnp.float32)
    out2 = jax.block_until_ready(
        channel_attention(x2, w1, w2, block_bytes=512 * 1024))
    ref2 = channel_attention_ref(x2, w1, w2)
    assert jnp.allclose(out2, ref2, atol=1e-5, rtol=1e-5), "mismatch (ragged)"

    # 3) Small-batch L-split (two-TensorCore) path.
    x3 = jax.random.normal(jax.random.PRNGKey(2), (2, C, 2048), jnp.float32)
    out3 = jax.block_until_ready(
        channel_attention(x3, w1, w2, block_bytes=128 * 1024))
    ref3 = channel_attention_ref(x3, w1, w2)
    assert jnp.allclose(out3, ref3, atol=1e-5, rtol=1e-5), "mismatch (split)"

    print("KERNEL_OK")
</pallas_src>

<mosaic_0001>
module attributes {stable_mosaic.version = 11 : i64} {
  func.func @_fused_kernel(%arg0: i32, %arg1: i32, %arg2: memref<2x32x16xf32, #tpu.memory_space<vmem>>, %arg3: memref<32x2xf32, #tpu.memory_space<vmem>>, %arg4: memref<2x32xf32, #tpu.memory_space<vmem>>, %arg5: memref<2x32x1xf32, #tpu.memory_space<vmem>>, %arg6: memref<2x32xf32, #tpu.memory_space<vmem>>, %arg7: memref<2x32xf32, #tpu.memory_space<vmem>>) attributes {dimension_semantics = [#tpu.dimension_semantics<parallel>, #tpu.dimension_semantics<arbitrary>], iteration_bounds = array<i64: 1, 1>, scalar_prefetch = 0 : i64, scratch_operands = 2 : i64, tpu.core_type = #tpu.core_type<tc>, window_params = [{transform_indices = @transform_0, window_bounds = array<i64: 2, 32, 16>}, {pipeline_mode = #tpu.pipeline_mode<synchronous>, transform_indices = @transform_1, window_bounds = array<i64: 32, 2>}, {pipeline_mode = #tpu.pipeline_mode<synchronous>, transform_indices = @transform_2, window_bounds = array<i64: 2, 32>}, {transform_indices = @transform_3, window_bounds = array<i64: 2, 32, 1>}]} {
    %c0 = arith.constant 0 : index
    %c0_0 = arith.constant 0 : index
    %c0_1 = arith.constant 0 : index
    %0 = vector.load %arg2[%c0, %c0_0, %c0_1] : memref<2x32x16xf32, #tpu.memory_space<vmem>>, vector<2x32x16xf32>
    %cst = arith.constant dense<0xFF800000> : vector<2x32xf32>
    %1 = vector.multi_reduction <maximumf>, %0, %cst [2] : vector<2x32x16xf32> to vector<2x32xf32>
    %cst_2 = arith.constant dense<0.000000e+00> : vector<2x32xf32>
    %2 = vector.multi_reduction <add>, %0, %cst_2 [2] : vector<2x32x16xf32> to vector<2x32xf32>
    %c0_i32 = arith.constant 0 : i32
    %3 = arith.cmpi eq, %arg1, %c0_i32 : i32
    %4 = arith.extui %3 : i1 to i32
    %c0_i32_3 = arith.constant 0 : i32
    %5 = arith.cmpi ne, %4, %c0_i32_3 : i32
    scf.if %5 {
      %c0_8 = arith.constant 0 : index
      %c0_9 = arith.constant 0 : index
      %12 = vector.load %arg6[%c0_8, %c0_9] : memref<2x32xf32, #tpu.memory_space<vmem>>, vector<2x32xf32>
      tpu.vector_store %arg6[%c0_8, %c0_9], %1 {strides = array<i32>} : memref<2x32xf32, #tpu.memory_space<vmem>>, vector<2x32xf32>,
      %c0_10 = arith.constant 0 : index
      %c0_11 = arith.constant 0 : index
      %13 = vector.load %arg7[%c0_10, %c0_11] : memref<2x32xf32, #tpu.memory_space<vmem>>, vector<2x32xf32>
      tpu.vector_store %arg7[%c0_10, %c0_11], %2 {strides = array<i32>} : memref<2x32xf32, #tpu.memory_space<vmem>>, vector<2x32xf32>,
    } else {
    }
    %c0_i32_4 = arith.constant 0 : i32
    %6 = arith.cmpi sgt, %arg1, %c0_i32_4 : i32
    %7 = arith.extui %6 : i1 to i32
    %c0_i32_5 = arith.constant 0 : i32
    %8 = arith.cmpi ne, %7, %c0_i32_5 : i32
    scf.if %8 {
      %c0_8 = arith.constant 0 : index
      %c0_9 = arith.constant 0 : index
      %12 = vector.load %arg6[%c0_8, %c0_9] : memref<2x32xf32, #tpu.memory_space<vmem>>, vector<2x32xf32>
      %13 = arith.maximumf %12, %1 : vector<2x32xf32>
      %c0_10 = arith.constant 0 : index
      %c0_11 = arith.constant 0 : index
      %14 = vector.load %arg6[%c0_10, %c0_11] : memref<2x32xf32, #tpu.memory_space<vmem>>, vector<2x32xf32>
      tpu.vector_store %arg6[%c0_10, %c0_11], %13 {strides = array<i32>} : memref<2x32xf32, #tpu.memory_space<vmem>>, vector<2x32xf32>,
      %c0_12 = arith.constant 0 : index
      %c0_13 = arith.constant 0 : index
      %15 = vector.load %arg7[%c0_12, %c0_13] : memref<2x32xf32, #tpu.memory_space<vmem>>, vector<2x32xf32>
      %16 = arith.addf %15, %2 : vector<2x32xf32>
      %c0_14 = arith.constant 0 : index
      %c0_15 = arith.constant 0 : index
      %17 = vector.load %arg7[%c0_14, %c0_15] : memref<2x32xf32, #tpu.memory_space<vmem>>, vector<2x32xf32>
      tpu.vector_store %arg7[%c0_14, %c0_15], %16 {strides = array<i32>} : memref<2x32xf32, #tpu.memory_space<vmem>>, vector<2x32xf32>,
    } else {
    }
    %c0_i32_6 = arith.constant 0 : i32
    %9 = arith.cmpi eq, %arg1, %c0_i32_6 : i32
    %10 = arith.extui %9 : i1 to i32
    %c0_i32_7 = arith.constant 0 : i32
    %11 = arith.cmpi ne, %10, %c0_i32_7 : i32
    scf.if %11 {
      %c0_8 = arith.constant 0 : index
      %c0_9 = arith.constant 0 : index
      %12 = vector.load %arg6[%c0_8, %c0_9] : memref<2x32xf32, #tpu.memory_space<vmem>>, vector<2x32xf32>
      %c0_10 = arith.constant 0 : index
      %c0_11 = arith.constant 0 : index
      %13 = vector.load %arg7[%c0_10, %c0_11] : memref<2x32xf32, #tpu.memory_space<vmem>>, vector<2x32xf32>
      %cst_12 = arith.constant 6.250000e-02 : f32
      %14 = vector.broadcast %cst_12 : f32 to vector<2x32xf32>
      %15 = arith.mulf %13, %14 : vector<2x32xf32>
      %16 = tpu.concatenate %12, %15 in 0 : vector<2x32xf32>, vector<2x32xf32> -> vector<4x32xf32>
      %c0_13 = arith.constant 0 : index
      %c0_14 = arith.constant 0 : index
      %17 = vector.load %arg3[%c0_13, %c0_14] : memref<32x2xf32, #tpu.memory_space<vmem>>, vector<32x2xf32>
      %c0_15 = arith.constant 0 : index
      %c0_16 = arith.constant 0 : index
      %18 = vector.load %arg4[%c0_15, %c0_16] : memref<2x32xf32, #tpu.memory_space<vmem>>, vector<2x32xf32>
      %cst_17 = arith.constant dense<0.000000e+00> : vector<4x2xf32>
      %19 = tpu.matmul %16, %17, %cst_17 {dimension_numbers = #tpu.dot_dimension_numbers<[1], [0], [0], [1], [0, 0, 1, 1], [], []>} : vector<4x32xf32>, vector<32x2xf32>, vector<4x2xf32> -> vector<4x2xf32>
      %cst_18 = arith.constant 0.000000e+00 : f32
      %20 = vector.broadcast %cst_18 : f32 to vector<4x2xf32>
      %21 = arith.maximumf %19, %20 : vector<4x2xf32>
      %cst_19 = arith.constant dense<0.000000e+00> : vector<4x32xf32>
      %22 = tpu.matmul %21, %18, %cst_19 {dimension_numbers = #tpu.dot_dimension_numbers<[1], [0], [0], [1], [0, 0, 1, 1], [], []>} : vector<4x2xf32>, vector<2x32xf32>, vector<4x32xf32> -> vector<4x32xf32>
      %23 = vector.extract_strided_slice %22 {offsets = [0, 0], sizes = [2, 32], strides = [1, 1]} : vector<4x32xf32> to vector<2x32xf32>
      %24 = vector.extract_strided_slice %22 {offsets = [2, 0], sizes = [2, 32], strides = [1, 1]} : vector<4x32xf32> to vector<2x32xf32>
      %25 = arith.addf %23, %24 : vector<2x32xf32>
      %cst_20 = arith.constant 0.000000e+00 : f32
      %26 = vector.broadcast %cst_20 : f32 to vector<2x32xf32>
      %27 = arith.subf %26, %25 : vector<2x32xf32>
      %28 = math.exp %27 : vector<2x32xf32>
      %cst_21 = arith.constant 1.000000e+00 : f32
      %29 = vector.broadcast %cst_21 : f32 to vector<2x32xf32>
      %30 = arith.addf %29, %28 : vector<2x32xf32>
      %cst_22 = arith.constant 1.000000e+00 : f32
      %31 = vector.broadcast %cst_22 : f32 to vector<2x32xf32>
      %32 = arith.divf %31, %30 : vector<2x32xf32>
      %33 = vector.shape_cast %32 : vector<2x32xf32> to vector<2x32x1xf32>
      %c0_23 = arith.constant 0 : index
      %c0_24 = arith.constant 0 : index
      %c0_25 = arith.constant 0 : index
      %34 = vector.load %arg5[%c0_23, %c0_24, %c0_25] : memref<2x32x1xf32, #tpu.memory_space<vmem>>, vector<2x32x1xf32>
      tpu.vector_store %arg5[%c0_23, %c0_24, %c0_25], %33 {strides = array<i32>} : memref<2x32x1xf32, #tpu.memory_space<vmem>>, vector<2x32x1xf32>,
    } else {
    }
    return
  }
  func.func @transform_0(%arg0: i32, %arg1: i32) -> (i32, i32, i32) {
    %c0_i32 = arith.constant 0 : i32
    %c0_i32_0 = arith.constant 0 : i32
    return %arg0, %c0_i32, %arg1 : i32, i32, i32
  }
  func.func @transform_1(%arg0: i32, %arg1: i32) -> (i32, i32) {
    %c0_i32 = arith.constant 0 : i32
    %c0_i32_0 = arith.constant 0 : i32
    %c0_i32_1 = arith.constant 0 : i32
    return %c0_i32, %c0_i32_0 : i32, i32
  }
  func.func @transform_2(%arg0: i32, %arg1: i32) -> (i32, i32) {
    %c0_i32 = arith.constant 0 : i32
    %c0_i32_0 = arith.constant 0 : i32
    %c0_i32_1 = arith.constant 0 : i32
    return %c0_i32, %c0_i32_0 : i32, i32
  }
  func.func @transform_3(%arg0: i32, %arg1: i32) -> (i32, i32, i32) {
    %c0_i32 = arith.constant 0 : i32
    %c0_i32_0 = arith.constant 0 : i32
    %c0_i32_1 = arith.constant 0 : i32
    return %arg0, %c0_i32, %c0_i32_0 : i32, i32, i32
  }
}

</mosaic_0001>

<bundles_post_ra>
// kernel: tpu_custom_call.1
= control target key start
LH: loop header
LB: loop body
LE: loop exit
PB: predicated region body
PF: predicated region fallthrough
CT: control target
= control target key end

     0   :  { %vm22_vm0 = vcmask 130048   ;;  %v560_v24 = vmov 0.0   ;;  %vm561_vm1 = vmmov 0   ;;  %v83_v29 = vlaneseq  ;;  %s693_s0 = inlined_call_operand.vmem [shape: f32[2,32,16], index: 0, kind: input, shape index: {}]   ;;  %s694_s1 = inlined_call_operand.vmem [shape: f32[32,2], index: 1, kind: input, shape index: {}]   ;;  %s695_s2 = inlined_call_operand.vmem [shape: f32[2,32], index: 2, kind: input, shape index: {}]   ;;  %s696_s3 = inlined_call_operand.vmem [shape: f32[2,32,1], index: 3, kind: output, shape index: {}]  }
   0x1   :  { %v18_v0 = vld [vmem:[%s693_s0 + $0x20] sm:$0xff]  ;;  %v19_v2 = vld [vmem:[%s693_s0 + $0x28] sm:$0xff]  ;;  %v20_v8 = vld [vmem:[%s693_s0 + $0x30] sm:$0xff]  ;;  %538 = vmatprep.subr.mxu0 %v560_v24  ;;  %546 = vmatprep.mubr.msk.f32.mxu0 %vm561_vm1, %v560_v24  ;;  %vm94_vm2 = vcmask 130112   ;;  %vm101_vm3 = vcmask 195712   ;;  %vm108_vm4 = vcmask 261312  }
   0x2   :  { %v14_v1 = vld [vmem:[%s693_s0] sm:$0xff]  ;;  %v59_v3 = vsel %vm22_vm0, %v18_v0, 0.0  ;;  %v15_v5 = vld [vmem:[%s693_s0 + $0x8] sm:$0xff]  ;;  %v62_v6 = vsel %vm22_vm0, %v19_v2, 0.0  ;;  %v16_v9 = vld [vmem:[%s693_s0 + $0x10] sm:$0xff]  ;;  %v65_v10 = vsel %vm22_vm0, %v20_v8, 0.0  ;;  %549 = vmatprep.subr.mxu1 %v560_v24  ;;  %551 = vmatprep.mubr.msk.f32.mxu1 %vm561_vm1, %v560_v24 }
   0x3   :  { %v47_v4 = vsel %vm22_vm0, %v14_v1, 0.0  ;;  %60 = vadd.xlane.f32.xlu1 %v59_v3  ;;  %v50_v7 = vsel %vm22_vm0, %v15_v5, 0.0  ;;  %v53_v11 = vsel %vm22_vm0, %v16_v9, 0.0  ;;  %v21_v12 = vld [vmem:[%s693_s0 + $0x38] sm:$0xff]  ;;  %v26_v16 = vsel %vm22_vm0, %v15_v5, -inf  ;;  %v312_v26 = vld [vmem:[%s694_s1 + $0x10] sm:$0xff] }
   0x4   :  { %48 = vadd.xlane.f32.xlu0 %v47_v4  ;;  %v17_v13 = vld [vmem:[%s693_s0 + $0x18] sm:$0xff]  ;;  %v68_v14 = vsel %vm22_vm0, %v21_v12, 0.0  ;;  %v23_v17 = vsel %vm22_vm0, %v14_v1, -inf  ;;  %v38_v18 = vsel %vm22_vm0, %v19_v2, -inf  ;;  %v35_v19 = vsel %vm22_vm0, %v18_v0, -inf  ;;  %v311_v27 = vld [vmem:[%s694_s1 + $0x8] sm:$0xff] }
   0x5   :  { %v56_v15 = vsel %vm22_vm0, %v17_v13, 0.0  ;;  %v41_v20 = vsel %vm22_vm0, %v20_v8, -inf  ;;  %v29_v21 = vsel %vm22_vm0, %v16_v9, -inf  ;;  %v44_v22 = vsel %vm22_vm0, %v21_v12, -inf  ;;  %v313_v25 = vld [vmem:[%s694_s1 + $0x18] sm:$0xff]  ;;  %v310_v28 = vld [vmem:[%s694_s1] sm:$0xff] }
   0x6   :  { %v32_v23 = vsel %vm22_vm0, %v17_v13, -inf  ;;  %539 = vmatpush3.msra.mxu0 %v313_v25  ;;  %v84_v30 = vand.u32 127, %v83_v29  ;;  %v634_v35 = vshrl.u32 %v83_v29, 7  ;;  %vm129_vm5 = vcmask 1041409  }
   0x7   :  { %63 = vadd.xlane.f32.xlu1 %v62_v6  ;;  %540 = vmatprep.subr.mxu0 %v560_v24  ;;  %vm132_vm6 = vcmask 254976   ;;  %vm308_vm7 = vcmask 1041408   ;;  %vm315_vm8 = vcmask 261120   ;;  %vm390_vm9 = vcmask 15360  }
   0x8   :  { %51 = vadd.xlane.f32.xlu0 %v50_v7  ;;  %541 = vmatpush3.msra.mxu0 %v312_v26  ;;  %v89_v33 = vadd.s32 4294967288, %v84_v30  ;;  %v96_v34 = vadd.s32 4294967280, %v84_v30  ;;  %v103_v39 = vadd.s32 4294967272, %v84_v30  ;;  %v87_v41 = vsub.s32 %v84_v30, %v634_v35  ;;  %v314_v26 = vld [vmem:[%s695_s2] sm:$0x3] }
   0x9   :  { %542 = vmatprep.subr.mxu0 %v560_v24  ;;  %550 = vmatpush3.msk.msra.mxu1 %vm308_vm7, %v314_v26  ;;  %vm515_vm10 = vcmask 7168  }
   0xa   :  { %543 = vmatpush3.msra.mxu0 %v311_v27  ;;  %v92_v38 = vsub.s32 %v89_v33, %v634_v35  ;;  %v99_v40 = vsub.s32 %v96_v34, %v634_v35  ;;  %v106_v46 = vsub.s32 %v103_v39, %v634_v35  ;;  %v479_v39 = vsub.s32 0, %v634_v35 }
   0xb   :  { %66 = vadd.xlane.f32.xlu1 %v65_v10  ;;  %544 = vmatprep.subr.mxu0 %v560_v24 }
   0xc   :  { %54 = vadd.xlane.f32.xlu0 %v53_v11  ;;  %545 = vmatpush3.msra.mxu0 %v310_v28 }
   0xf   :  { %69 = vadd.xlane.f32.xlu1 %v68_v14 }
  0x10   :  { %57 = vadd.xlane.f32.xlu0 %v56_v15 }
  0x13   :  { %27 = vmax.xlane.f32.xlu1 %v26_v16 }
  0x14   :  { %24 = vmax.xlane.f32.xlu0 %v23_v17 }
  0x17   :  { %39 = vmax.xlane.f32.xlu1 %v38_v18 }
  0x18   :  { %36 = vmax.xlane.f32.xlu0 %v35_v19 }
  0x1b   :  { %42 = vmax.xlane.f32.xlu1 %v41_v20 }
  0x1c   :  { %30 = vmax.xlane.f32.xlu0 %v29_v21 }
  0x1f   :  { %45 = vmax.xlane.f32.xlu1 %v44_v22 }
  0x20   :  { %33 = vmax.xlane.f32.xlu0 %v32_v23 }
  0x8c   :  { %v61_v31 = vpop.xlane.xlu1 %60 }
  0x8d   :  { %v49_v32 = vpop.xlane.xlu0 %48  ;;  %v164_v49 = vrot.slane %v61_v31, %v87_v41 }
  0x8e   :  { %v145_v50 = vrot.slane %v49_v32, %v87_v41 }
  0x90   :  { %v64_v36 = vpop.xlane.xlu1 %63 }
  0x91   :  { %v52_v37 = vpop.xlane.xlu0 %51  ;;  %v168_v44 = vrot.slane %v64_v36, %v92_v38 }
  0x92   :  { %v149_v45 = vrot.slane %v52_v37, %v92_v38 }
  0x93   :  { %v169_v53 = vsel %vm94_vm2, %v168_v44, %v164_v49 }
  0x94   :  { %v67_v42 = vpop.xlane.xlu1 %66  ;;  %v150_v54 = vsel %vm94_vm2, %v149_v45, %v145_v50 }
  0x95   :  { %v55_v43 = vpop.xlane.xlu0 %54  ;;  %v173_v47 = vrot.slane %v67_v42, %v99_v40  ;;  %v498_v42 = vsub.s32 1, %v634_v35 }
  0x96   :  { %v154_v48 = vrot.slane %v55_v43, %v99_v40 }
  0x97   :  { %v174_v57 = vsel %vm101_vm3, %v173_v47, %v169_v53 }
  0x98   :  { %v70_v51 = vpop.xlane.xlu1 %69  ;;  %v155_v58 = vsel %vm101_vm3, %v154_v48, %v150_v54 }
  0x99   :  { %v58_v52 = vpop.xlane.xlu0 %57  ;;  %v178_v55 = vrot.slane %v70_v51, %v106_v46 }
  0x9a   :  { %v159_v56 = vrot.slane %v58_v52, %v106_v46 }
  0x9b   :  { %v179_v59 = vsel %vm108_vm4, %v178_v55, %v174_v57 }
  0x9c   :  { %v160_v60 = vsel %vm108_vm4, %v159_v56, %v155_v58  ;;  %v28_v62 = vpop.xlane.xlu1 %27 }
  0x9d   :  { %v180_v61 = vsel %vm129_vm5, %v179_v59, %v160_v60  ;;  %v25_v63 = vpop.xlane.xlu0 %24  ;;  %v93_v4 = vrot.slane %v28_v62, %v92_v38 }
  0x9e   :  { %182 = vst.msk [vmem:[#allocation3] sm:$0x3] %vm132_vm6, %v180_v61  ;;  %v88_v5 = vrot.slane %v25_v63, %v87_v41 }
  0xa0   :  { %v40_v0 = vpop.xlane.xlu1 %39  ;;  %v95_v12 = vsel %vm94_vm2, %v93_v4, %v88_v5 }
  0xa1   :  { %v37_v1 = vpop.xlane.xlu0 %36  ;;  %v117_v6 = vrot.slane %v40_v0, %v92_v38 }
  0xa2   :  { %v113_v7 = vrot.slane %v37_v1, %v87_v41 }
  0xa4   :  { %v43_v2 = vpop.xlane.xlu1 %42  ;;  %v118_v13 = vsel %vm94_vm2, %v117_v6, %v113_v7 }
  0xa5   :  { %v31_v3 = vpop.xlane.xlu0 %30  ;;  %v122_v8 = vrot.slane %v43_v2, %v99_v40  ;;  %v303_v21 = vld [vmem:[#allocation3] sm:$0x3] }
  0xa6   :  { %v100_v9 = vrot.slane %v31_v3, %v99_v40  ;;  %v304_v22 = vmul.f32 0.0625, %v303_v21 }
  0xa7   :  { %v123_v16 = vsel %vm101_vm3, %v122_v8, %v118_v13 }
  0xa8   :  { %v46_v10 = vpop.xlane.xlu1 %45  ;;  %v102_v17 = vsel %vm101_vm3, %v100_v9, %v95_v12  ;;  %v306_v23 = vrot.slane %v304_v22, 6 }
  0xa9   :  { %v34_v11 = vpop.xlane.xlu0 %33  ;;  %v127_v14 = vrot.slane %v46_v10, %v106_v46 }
  0xaa   :  { %v107_v15 = vrot.slane %v34_v11, %v106_v46 }
  0xab   :  { %v128_v18 = vsel %vm108_vm4, %v127_v14, %v123_v16 }
  0xac   :  { %v109_v19 = vsel %vm108_vm4, %v107_v15, %v102_v17 }
  0xad   :  { %v130_v20 = vsel %vm129_vm5, %v128_v18, %v109_v19 }
  0xae   :  { %133 = vst.msk [vmem:[#allocation2] sm:$0x3] %vm132_vm6, %v130_v20 }
  0xb5   :  { %v302_v24 = vld [vmem:[#allocation2] sm:$0x3] }
  0xb6   :  { %v309_v25 = vsel %vm308_vm7, %v302_v24, %v306_v23 }
  0xb7   :  { %547 = vmatmul.mubr.msk.f32.vlgmr.msra.gmra.mxu0 %vm315_vm8, %v309_v25 }
 0x177   :  { %v385_v27 = vpop.f32.mrf.mxu0 }
 0x178   :  { %v389_v28 = vmax.f32 %v385_v27, 0.0 }
 0x179   :  { %v548_v29 = vpop.f32.mrf.mxu0 }
 0x17a   :  { %552 = vmatmul.mubr.msk.f32.vlgmr.msra.gmra.mxu1 %vm390_vm9, %v389_v28 }
 0x23a   :  { %v463_v30 = vpop.f32.mrf.mxu1 }
 0x23b   :  { %v468_v31 = vrot.slane %v463_v30, 2 }
 0x23c   :  { %v553_v32 = vpop.f32.mrf.mxu1 }
 0x23d   :  { %v470_v33 = vadd.f32 %v468_v31, %v463_v30 }
 0x23f   :  { %v471_v34 = vsub.f32 0.0, %v470_v33 }
 0x241   :  { %v472_v36 = vmul.f32 1.442695, %v471_v34 }
 0x243   :  { %556 = vpow2.f32 %v472_v36 }
 0x250   :  { %v557_v37 = vpop.eup %556 }
 0x251   :  { %v474_v38 = vadd.f32 1.0, %v557_v37 }
 0x253   :  { %558 = vrcp.f32 %v474_v38 }
 0x260   :  { %v559_v40 = vpop.eup %558 }
 0x261   :  { %v480_v41 = vrot.slane %v559_v40, %v479_v39  ;;  %v499_v43 = vrot.slane %v559_v40, %v498_v42 }
 0x263   :  { %486 = vbcast.lane.b32.xlu1 %v480_v41, 264  ;;  %482 = vbcast.lane.b32.xlu0 %v480_v41, 256 }
 0x267   :  { %490 = vbcast.lane.b32.xlu1 %v480_v41, 272  ;;  %501 = vbcast.lane.b32.xlu0 %v499_v43, 256 }
 0x26b   :  { %494 = vbcast.lane.b32.xlu1 %v480_v41, 280  ;;  %509 = vbcast.lane.b32.xlu0 %v499_v43, 272 }
 0x26f   :  { %505 = vbcast.lane.b32.xlu1 %v499_v43, 264 }
 0x273   :  { %513 = vbcast.lane.b32.xlu1 %v499_v43, 280 }
 0x2d5   :  { %v487_v44 = vpop.permute.xlu1 %486  ;;  %v483_v45 = vpop.permute.xlu0 %482 }
 0x2d6   :  { %517 = vst.msk [vmem:[%s696_s3 + $0x8] sm:$0xff] %vm515_vm10, %v487_v44  ;;  %516 = vst.msk [vmem:[%s696_s3] sm:$0xff] %vm515_vm10, %v483_v45 }
 0x2d9   :  { %v491_v35 = vpop.permute.xlu1 %490  ;;  %v502_v46 = vpop.permute.xlu0 %501 }
 0x2da   :  { %518 = vst.msk [vmem:[%s696_s3 + $0x10] sm:$0xff] %vm515_vm10, %v491_v35  ;;  %520 = vst.msk [vmem:[%s696_s3 + $0x20] sm:$0xff] %vm515_vm10, %v502_v46 }
 0x2dd   :  { %v495_v47 = vpop.permute.xlu1 %494  ;;  %v510_v48 = vpop.permute.xlu0 %509 }
 0x2de   :  { %519 = vst.msk [vmem:[%s696_s3 + $0x18] sm:$0xff] %vm515_vm10, %v495_v47  ;;  %522 = vst.msk [vmem:[%s696_s3 + $0x30] sm:$0xff] %vm515_vm10, %v510_v48 }
 0x2e1   :  { %v506_v49 = vpop.permute.xlu1 %505 }
 0x2e2   :  { %521 = vst.msk [vmem:[%s696_s3 + $0x28] sm:$0xff] %vm515_vm10, %v506_v49 }
 0x2e5   :  { %v514_v50 = vpop.permute.xlu1 %513 }
 0x2e6   :  { %523 = vst.msk [vmem:[%s696_s3 + $0x38] sm:$0xff] %vm515_vm10, %v514_v50 }

</bundles_post_ra>
